<compile_context>
chip_gen: v6e
topology: v6e:2x2x1
jax: 0.10.0
libtpu: 0.0.40
codegen_flags: <defaults>
</compile_context>

<pallas_src>
import functools

import jax
import jax.numpy as jnp
from jax.experimental import pallas as pl
from jax.experimental.pallas import tpu as pltpu


def bahdanau_attention_kernel(img_ref, uh_ref, wwt_ref, vw_ref, vb_ref,
                              ctx_ref, alpha_ref, *, l_valid):
    tb, L_pad, E = img_ref.shape          # static block dims
    H = wwt_ref.shape[1]

    img = img_ref[...]                    # (tb, Lp, E), bf16

    # One fused projection GEMM for the whole batch tile on the MXU:
    #   (tb*Lp, E) @ (E, H) -> (tb*Lp, H), f32 accumulation.  Lp is padded to a
    # multiple of 16 so this reshape is a pure sublane relabeling (no relayout).
    w_s = jnp.dot(img.reshape(tb * L_pad, E), wwt_ref[...],
                  preferred_element_type=jnp.float32).reshape(tb, L_pad, H)

    # uh already carries b_U + b_W (folded in the wrapper); kept f32 (tiny).
    att = jnp.tanh(w_s + uh_ref[...][:, None, :])          # (tb, Lp, H)

    # e = att @ v^T + b_v as a lane-axis contraction -> lane-dense (tb, Lp).
    e = jnp.sum(att * vw_ref[...], axis=-1) + vb_ref[0]    # (tb, Lp)

    # Mask padded image positions before the softmax.
    if l_valid < L_pad:
        lane = jax.lax.broadcasted_iota(jnp.int32, (tb, L_pad), 1)
        e = jnp.where(lane < l_valid, e, -jnp.inf)

    # Softmax over the L image regions (lane axis).
    m = jnp.max(e, axis=-1, keepdims=True)                 # (tb, 1)
    p = jnp.exp(e - m)                                     # (tb, Lp)
    inv = pl.reciprocal(jnp.sum(p, axis=-1, keepdims=True), approx=True)
    alpha = p * inv                                        # (tb, Lp)
    alpha_ref[...] = alpha

    # context: per-sample (1, Lp) @ (Lp, E) batched MXU matmul, bf16 x bf16 with
    # f32 accumulation.  Padded positions contribute alpha == 0 (exp(-inf)).
    ctx = jnp.einsum('bql,ble->bqe',
                     alpha[:, None, :].astype(img.dtype), img,
                     preferred_element_type=jnp.float32)   # (tb, 1, E)
    ctx_ref[...] = ctx[:, 0, :]


def _vmem_capacity_bytes():
    try:
        return int(pltpu.get_tpu_info().vmem_capacity_bytes)
    except Exception:
        return 64 << 20          # conservative (v7x has the smallest VMEM)


def _tile_bytes(tb, L_pad, E, H):
    """Per-step VMEM footprint estimate (includes double-buffered streams)."""
    img = 2 * (tb * L_pad * E) * 2       # bf16 img tile, x2 buffers
    inter = (tb * L_pad * H) * 4 * 2     # f32 w_s + att intermediates
    wres = 2 * (E * H) * 2               # bf16 W^T block (resident, x2 buffers)
    uh = 2 * (tb * H) * 4                # f32 uh tile, x2 buffers
    outs = 2 * (tb * (E + L_pad)) * 4    # f32 ctx + alpha, x2 buffers
    return img + inter + wres + uh + outs + (1 << 20)


def _pick_batch_tile(B, L_pad, E, H, budget_bytes):
    """Batch rows per grid step.

    Prefer >= 4 grid steps (DMA/compute overlap) and >= 2 (both v7x TCs under
    the "parallel" grid axis), with the largest multiple-of-8 tile that fits
    the VMEM budget.  B <= 8 cannot be split below the sublane pack.
    """
    if B <= 8:
        return B
    fits = [tb for tb in range(8, (B // 8) * 8 + 1, 8)
            if _tile_bytes(tb, L_pad, E, H) <= budget_bytes]
    if not fits:
        return 8
    for min_steps in (4, 2, 1):
        good = [tb for tb in fits if -(-B // tb) >= min_steps]
        if good:
            return max(good)
    return max(fits)


def bahdanau_attention(img_features, hidden_state, params):
    """img_features: [B, L, E] f32, hidden_state: [B, H] f32."""
    B, L, E = img_features.shape
    H = hidden_state.shape[1]

    # Hoisted out of the kernel: one batched [B,H]@[H,H] GEMM, with both linear
    # biases folded in (tanh(img@W.T + b_W + hid@U.T + b_U)).
    u_h = hidden_state @ params["U_w"].T + params["U_b"] + params["W_b"]  # (B,H)

    # Pad L to a multiple of 16 (bf16 sublane packing) so the in-kernel reshape
    # is free; padded positions get masked to -inf before the softmax.
    L_pad = -(-L // 16) * 16

    cap = _vmem_capacity_bytes()
    budget = max(16 << 20, cap // 2)
    tb = _pick_batch_tile(B, L_pad, E, H, budget)
    B_pad = -(-B // tb) * tb

    img = img_features
    if (B_pad, L_pad) != (B, L):
        img = jnp.pad(img, ((0, B_pad - B), (0, L_pad - L), (0, 0)))
    if B_pad != B:
        u_h = jnp.pad(u_h, ((0, B_pad - B), (0, 0)))

    # Stream the dominant GEMM operands as bf16 (native MXU dtype, halves the
    # HBM-bound img stream); f32 accumulation happens inside the kernel.
    img_bf = img.astype(jnp.bfloat16)
    ww_t = params["W_w"].T.astype(jnp.bfloat16)            # (E, H)
    vw = params["v_w"].reshape(1, H).astype(jnp.float32)   # (1, H)
    vb = params["v_b"].reshape(1).astype(jnp.float32)      # (1,) -> SMEM scalar

    grid = (B_pad // tb,)
    vmem_limit = int(min(cap, max(32 << 20,
                                  1.3 * _tile_bytes(tb, L_pad, E, H))))

    kernel = functools.partial(bahdanau_attention_kernel, l_valid=L)

    ctx, alpha = pl.pallas_call(
        kernel,
        out_shape=(jax.ShapeDtypeStruct((B_pad, E), jnp.float32),
                   jax.ShapeDtypeStruct((B_pad, L_pad), jnp.float32)),
        grid_spec=pltpu.PrefetchScalarGridSpec(
            num_scalar_prefetch=0,
            grid=grid,
            in_specs=[
                pl.BlockSpec((tb, L_pad, E), lambda i: (i, 0, 0)),   # img tile
                pl.BlockSpec((tb, H),        lambda i: (i, 0)),      # U_h+biases
                pl.BlockSpec((E, H),         lambda i: (0, 0)),      # W^T
                pl.BlockSpec((1, H),         lambda i: (0, 0)),      # v row
                pl.BlockSpec(memory_space=pltpu.MemorySpace.SMEM),   # b_v scalar
            ],
            out_specs=[
                pl.BlockSpec((tb, E),     lambda i: (i, 0)),         # context
                pl.BlockSpec((tb, L_pad), lambda i: (i, 0)),         # alpha
            ],
        ),
        compiler_params=pltpu.CompilerParams(
            dimension_semantics=("parallel",),
            vmem_limit_bytes=vmem_limit),
    )(img_bf, u_h, ww_t, vw, vb)

    return ctx[:B], alpha[:B, :L]


def reference(img_features, hidden_state, p):
    u_h = hidden_state @ p["U_w"].T + p["U_b"]                 # (B, H)
    w_s = img_features @ p["W_w"].T + p["W_b"]                 # (B, L, H)
    att = jnp.tanh(w_s + u_h[:, None, :])
    e = (att @ p["v_w"].T)[..., 0] + p["v_b"][0]               # (B, L)
    alpha = jax.nn.softmax(e, axis=1)
    ctx = jnp.sum(img_features * alpha[..., None], axis=1)
    return ctx, alpha


if __name__ == "__main__":
    B, L, E, H = 2, 16, 32, 32     # batch, num regions, encoder_dim, hidden_dim

    key = jax.random.PRNGKey(0)
    k_img, k_hid, k1, k2, k3, k4, k5, k6 = jax.random.split(key, 8)

    img_features = jax.random.normal(k_img, (B, L, E), dtype=jnp.float32)
    hidden_state = jax.random.normal(k_hid, (B, H), dtype=jnp.float32)

    # Deterministic parameter init (nn.Linear-shaped weights).
    params = {
        "U_w": 0.1 * jax.random.normal(k1, (H, H), dtype=jnp.float32),
        "U_b": 0.1 * jax.random.normal(k2, (H,), dtype=jnp.float32),
        "W_w": 0.1 * jax.random.normal(k3, (H, E), dtype=jnp.float32),
        "W_b": 0.1 * jax.random.normal(k4, (H,), dtype=jnp.float32),
        "v_w": 0.1 * jax.random.normal(k5, (1, H), dtype=jnp.float32),
        "v_b": 0.1 * jax.random.normal(k6, (1,), dtype=jnp.float32),
    }

    ctx, alpha = jax.jit(bahdanau_attention)(img_features, hidden_state, params)
    jax.block_until_ready((ctx, alpha))

    ctx_ref, alpha_ref = reference(img_features, hidden_state, params)
    assert ctx.shape == (B, E) and alpha.shape == (B, L)
    # Tolerances account for the bf16 img/W^T streams (f32 accumulation) and
    # the approximate EUP reciprocal in the softmax normalization.
    assert jnp.allclose(alpha, alpha_ref, rtol=2e-2, atol=2e-3)
    assert jnp.allclose(ctx, ctx_ref, rtol=2e-2, atol=1e-2)

    print("KERNEL_OK")
</pallas_src>

<mosaic_0001>
module attributes {stable_mosaic.version = 11 : i64} {
  func.func @bahdanau_attention_kernel(%arg0: i32, %arg1: memref<2x16x32xbf16, #tpu.memory_space<vmem>>, %arg2: memref<2x32xf32, #tpu.memory_space<vmem>>, %arg3: memref<32x32xbf16, #tpu.memory_space<vmem>>, %arg4: memref<1x32xf32, #tpu.memory_space<vmem>>, %arg5: memref<1xf32, #tpu.memory_space<smem>>, %arg6: memref<2x32xf32, #tpu.memory_space<vmem>>, %arg7: memref<2x16xf32, #tpu.memory_space<vmem>>) attributes {dimension_semantics = [#tpu.dimension_semantics<parallel>], iteration_bounds = array<i64: 1>, scalar_prefetch = 0 : i64, scratch_operands = 0 : i64, tpu.core_type = #tpu.core_type<tc>, window_params = [{transform_indices = @transform_0, window_bounds = array<i64: 2, 16, 32>}, {transform_indices = @transform_1, window_bounds = array<i64: 2, 32>}, {pipeline_mode = #tpu.pipeline_mode<synchronous>, transform_indices = @transform_2, window_bounds = array<i64: 32, 32>}, {pipeline_mode = #tpu.pipeline_mode<synchronous>, transform_indices = @transform_3, window_bounds = array<i64: 1, 32>}, {transform_indices = @transform_4, window_bounds = array<i64: 1>}, {transform_indices = @transform_5, window_bounds = array<i64: 2, 32>}, {transform_indices = @transform_6, window_bounds = array<i64: 2, 16>}]} {
    %c0 = arith.constant 0 : index
    %c0_0 = arith.constant 0 : index
    %c0_1 = arith.constant 0 : index
    %0 = vector.load %arg1[%c0, %c0_0, %c0_1] : memref<2x16x32xbf16, #tpu.memory_space<vmem>>, vector<2x16x32xbf16>
    %1 = vector.shape_cast %0 : vector<2x16x32xbf16> to vector<32x32xbf16>
    %c0_2 = arith.constant 0 : index
    %c0_3 = arith.constant 0 : index
    %2 = vector.load %arg3[%c0_2, %c0_3] : memref<32x32xbf16, #tpu.memory_space<vmem>>, vector<32x32xbf16>
    %cst = arith.constant dense<0.000000e+00> : vector<32x32xf32>
    %3 = tpu.matmul %1, %2, %cst {dimension_numbers = #tpu.dot_dimension_numbers<[1], [0], [0], [1], [0, 0, 1, 1], [], []>} : vector<32x32xbf16>, vector<32x32xbf16>, vector<32x32xf32> -> vector<32x32xf32>
    %4 = vector.shape_cast %3 : vector<32x32xf32> to vector<2x16x32xf32>
    %c0_4 = arith.constant 0 : index
    %c0_5 = arith.constant 0 : index
    %5 = vector.load %arg2[%c0_4, %c0_5] : memref<2x32xf32, #tpu.memory_space<vmem>>, vector<2x32xf32>
    %6 = vector.shape_cast %5 : vector<2x32xf32> to vector<2x1x32xf32>
    %7 = vector.broadcast %6 : vector<2x1x32xf32> to vector<2x16x32xf32>
    %8 = arith.addf %4, %7 : vector<2x16x32xf32>
    %9 = math.tanh %8 : vector<2x16x32xf32>
    %c0_6 = arith.constant 0 : index
    %c0_7 = arith.constant 0 : index
    %10 = vector.load %arg4[%c0_6, %c0_7] : memref<1x32xf32, #tpu.memory_space<vmem>>, vector<1x32xf32>
    %11 = vector.shape_cast %10 : vector<1x32xf32> to vector<1x1x32xf32>
    %12 = vector.broadcast %11 : vector<1x1x32xf32> to vector<2x16x32xf32>
    %13 = arith.mulf %9, %12 : vector<2x16x32xf32>
    %cst_8 = arith.constant dense<0.000000e+00> : vector<2x16xf32>
    %14 = vector.multi_reduction <add>, %13, %cst_8 [2] : vector<2x16x32xf32> to vector<2x16xf32>
    %c0_9 = arith.constant 0 : index
    %15 = memref.load %arg5[%c0_9] : memref<1xf32, #tpu.memory_space<smem>>
    %16 = vector.broadcast %15 : f32 to vector<2x16xf32>
    %17 = arith.addf %14, %16 : vector<2x16xf32>
    %cst_10 = arith.constant dense<0xFF800000> : vector<2xf32>
    %18 = vector.multi_reduction <maximumf>, %17, %cst_10 [1] : vector<2x16xf32> to vector<2xf32>
    %19 = vector.shape_cast %18 : vector<2xf32> to vector<2x1xf32>
    %20 = vector.broadcast %19 : vector<2x1xf32> to vector<2x16xf32>
    %21 = arith.subf %17, %20 : vector<2x16xf32>
    %22 = math.exp %21 : vector<2x16xf32>
    %cst_11 = arith.constant dense<0.000000e+00> : vector<2xf32>
    %23 = vector.multi_reduction <add>, %22, %cst_11 [1] : vector<2x16xf32> to vector<2xf32>
    %24 = vector.shape_cast %23 : vector<2xf32> to vector<2x1xf32>
    %25 = tpu.reciprocal %24 {approx = true} : vector<2x1xf32> -> vector<2x1xf32>
    %26 = vector.broadcast %25 : vector<2x1xf32> to vector<2x16xf32>
    %27 = arith.mulf %22, %26 : vector<2x16xf32>
    %c0_12 = arith.constant 0 : index
    %c0_13 = arith.constant 0 : index
    %28 = vector.load %arg7[%c0_12, %c0_13] : memref<2x16xf32, #tpu.memory_space<vmem>>, vector<2x16xf32>
    tpu.vector_store %arg7[%c0_12, %c0_13], %27 {strides = array<i32>} : memref<2x16xf32, #tpu.memory_space<vmem>>, vector<2x16xf32>,
    %29 = vector.shape_cast %27 : vector<2x16xf32> to vector<2x1x16xf32>
    %30 = arith.truncf %29 : vector<2x1x16xf32> to vector<2x1x16xbf16>
    "tpu.trace_start"() <{level = 10 : i32, message = "bql,ble->bqe"}> : () -> ()
    %cst_14 = arith.constant dense<0.000000e+00> : vector<2x1x32xf32>
    %31 = tpu.matmul %30, %0, %cst_14 {dimension_numbers = #tpu.dot_dimension_numbers<[2], [1], [1], [2], [0, 0, 0, 1, 1, 2], [0], [0]>} : vector<2x1x16xbf16>, vector<2x16x32xbf16>, vector<2x1x32xf32> -> vector<2x1x32xf32>
    "tpu.trace_stop"() : () -> ()
    %32 = vector.shape_cast %31 : vector<2x1x32xf32> to vector<2x32xf32>
    %c0_15 = arith.constant 0 : index
    %c0_16 = arith.constant 0 : index
    %33 = vector.load %arg6[%c0_15, %c0_16] : memref<2x32xf32, #tpu.memory_space<vmem>>, vector<2x32xf32>
    tpu.vector_store %arg6[%c0_15, %c0_16], %32 {strides = array<i32>} : memref<2x32xf32, #tpu.memory_space<vmem>>, vector<2x32xf32>,
    return
  }
  func.func @transform_0(%arg0: i32) -> (i32, i32, i32) {
    %c0_i32 = arith.constant 0 : i32
    %c0_i32_0 = arith.constant 0 : i32
    %c0_i32_1 = arith.constant 0 : i32
    return %arg0, %c0_i32, %c0_i32_0 : i32, i32, i32
  }
  func.func @transform_1(%arg0: i32) -> (i32, i32) {
    %c0_i32 = arith.constant 0 : i32
    %c0_i32_0 = arith.constant 0 : i32
    return %arg0, %c0_i32 : i32, i32
  }
  func.func @transform_2(%arg0: i32) -> (i32, i32) {
    %c0_i32 = arith.constant 0 : i32
    %c0_i32_0 = arith.constant 0 : i32
    %c0_i32_1 = arith.constant 0 : i32
    return %c0_i32, %c0_i32_0 : i32, i32
  }
  func.func @transform_3(%arg0: i32) -> (i32, i32) {
    %c0_i32 = arith.constant 0 : i32
    %c0_i32_0 = arith.constant 0 : i32
    %c0_i32_1 = arith.constant 0 : i32
    return %c0_i32, %c0_i32_0 : i32, i32
  }
  func.func @transform_4(%arg0: i32) -> i32 {
    %c0_i32 = arith.constant 0 : i32
    %c0_i32_0 = arith.constant 0 : i32
    return %c0_i32 : i32
  }
  func.func @transform_5(%arg0: i32) -> (i32, i32) {
    %c0_i32 = arith.constant 0 : i32
    %c0_i32_0 = arith.constant 0 : i32
    return %arg0, %c0_i32 : i32, i32
  }
  func.func @transform_6(%arg0: i32) -> (i32, i32) {
    %c0_i32 = arith.constant 0 : i32
    %c0_i32_0 = arith.constant 0 : i32
    return %arg0, %c0_i32 : i32, i32
  }
}

</mosaic_0001>

<bundles_post_ra>
// kernel: bahdanau_attention.1
= control target key start
LH: loop header
LB: loop body
LE: loop exit
PB: predicated region body
PF: predicated region fallthrough
CT: control target
= control target key end

     0   :  { %13 = vsyncpa [#allocation4], 0  ;;  %vm56_vm0 = vcmask 261120   ;;  %s739_s0 = inlined_call_operand.vmem [shape: bf16[2,16,32], index: 0, kind: input, shape index: {}]   ;;  %s740_s1 = inlined_call_operand.vmem [shape: f32[2,32], index: 1, kind: input, shape index: {}]   ;;  %s741_s2 = inlined_call_operand.vmem [shape: bf16[32,32], index: 2, kind: input, shape index: {}]   ;;  %s742_s3 = inlined_call_operand.vmem [shape: f32[1,32], index: 3, kind: input, shape index: {}]   ;;  %s743_s4 = inlined_call_operand.<no memory space> [shape: f32[1], index: 4, kind: input, shape index: {}]   ;;  %s744_s5 = inlined_call_operand.hbm [shape: f32[2,32], index: 5, kind: output, shape index: {0}]   ;;  %s745_s6 = inlined_call_operand.hbm [shape: f32[2,16], index: 6, kind: output, shape index: {1}]  }
   0x1   :  { %v541_v0 = vld [vmem:[%s741_s2 + $0x8] sm:$0xff]   ;;  %v542_v1 = vld [vmem:[%s741_s2] sm:$0xff]  }
   0x2   :  { %513 = vmatprep.subr.bf16.mxu0 %v541_v0  ;;  %v657_v2 = vld [vmem:[%s739_s0] sm:$0xff]  }
   0x3   :  { %514 = vmatpush3.bf16.msra.mxu0 %v541_v0  ;;  %517 = vmatprep.mubr.msk.bf16.mxu0 %vm56_vm0, %v657_v2 }
   0x4   :  { %515 = vmatprep.subr.bf16.mxu0 %v542_v1 }
   0x5   :  { %14 = vsyncpa [#allocation6], 0  ;;  %v664_v3 = vld [vmem:[%s739_s0 + $0x8] sm:$0xff]   ;;  %v607_v4 = vmov 1966171168   ;;  %v125_v6 = vlaneseq  ;;  %v178_v41 = vstv %s743_s4  ;;  %vm198_vm1 = vcmask 130112  }
   0x6   :  { %v123_v5 = vunpack.c.l.s4 %v607_v4  ;;  %v501_v9 = vld.sshfl [vmem:[%s740_s1] sm:$0x11 pattern:$0x75316420]  ;;  %vm209_vm2 = vcmask 1041409   ;;  %vm212_vm3 = vcmask 123904  }
   0x7   :  { %516 = vmatpush3.bf16.msra.mxu0 %v542_v1  ;;  %v668_v8 = vshrl.u32 %v125_v6, 7  ;;  %v121_v10 = vcombine.high %v501_v9, %v501_v9  ;;  %v502_v25 = vld [vmem:[%s742_s3] ss:$0 sm:$0xff]  ;;  %v188_v38 = vand.u32 127, %v125_v6  ;;  %v608_v59 = vmov 0   ;;  %s611_s4 = smov [#allocation5]  }
   0x8   :  { %v124_v7 = vunpack.c.0.s8 %v123_v5  ;;  %540 = vset.pattern.permute.xlu0 %v608_v59  ;;  %539 = vset.pattern.permute.xlu1 %v608_v59  ;;  %vm610_vm4 = vmmov 0   ;;  %vm353_vm5 = vcmask 130048   ;;  %s483_s7 = sshll.u32 %s611_s4, 4  ;;  %s484_s7 = int_to_ptr.vmem [resolvable:$true] %s483_s7 }
   0x9   :  { %v675_v13 = vsub.s32 0, %v668_v8  ;;  %v193_v39 = vadd.s32 4294967288, %v188_v38  ;;  %v693_v45 = vsub.s32 %v188_v38, %v668_v8  ;;  %v223_v60 = vsub.s32 1, %v668_v8  ;;  %s563_s8 = scalar_lea.vmem %s484_s7, 32  ;;  %p568_p1 = scmp.lt.s32.totalorder %s484_s7, %s484_s7 }
   0xa   :  { %518 = vmatmul.mubr.msk.bf16.vlgmr.msra.gmra.mxu0 %vm56_vm0, %v664_v3  ;;  %v127_v11 = vsub.s32 %v124_v7, %v668_v8  ;;  %p564_p0 = scmp.ne.s32.totalorder %s484_s7, %s563_s8  ;;  %p569_p2 = scmp.lt.s32.totalorder %s563_s8, %s563_s8 }
   0xb   :  { %v690_v43 = vsub.s32 %v193_v39, %v668_v8  ;;  %v609_v39 = vmov 0.0  }
   0xc   :  { %v135_v12 = vrot.slane %v121_v10, %v127_v11  ;;  %v128_v14 = vrot.slane %v501_v9, %v127_v11  ;;  %521 = vmatprep.subr.bf16.mxu1 %v609_v39  ;;  %523 = vmatprep.mubr.msk.bf16.mxu1 %vm610_vm4, %v609_v39  ;;  %p570_p3 = por %p569_p2, %p568_p1 }
   0xd   :  { %522 = vmatpush3.bf16.msra.mxu1 %v657_v2 }
   0xe   :  { %v143_v15 = vrot.slane %v135_v12, %v675_v13  ;;  %v139_v16 = vrot.slane %v128_v14, %v675_v13  ;;  %527 = vmatprep.subr.bf16.mxu1 %v609_v39  ;;  %p571_p4 = pnand %p570_p3, %p564_p0 }
  0xca   :  { %v519_v17 = vpop.f32.mrf.mxu0 }
  0xcb   :  { %v148_v18 = vadd.f32 %v519_v17, %v143_v15 }
  0xcc   :  { %v97_v19 = vpop.f32.mrf.mxu0 }
  0xcd   :  { %545 = vtanh.f32 %v148_v18  ;;  %v146_v20 = vadd.f32 %v139_v16, %v97_v19 }
  0xce   :  { %v520_v21 = vpop.f32.mrf.mxu0 }
  0xcf   :  { %547 = vtanh.f32 %v146_v20  ;;  %v149_v22 = vadd.f32 %v520_v21, %v143_v15 }
  0xd0   :  { %v100_v23 = vpop.f32.mrf.mxu0 }
  0xd1   :  { %549 = vtanh.f32 %v149_v22  ;;  %v147_v24 = vadd.f32 %v139_v16, %v100_v23 }
  0xd3   :  { %551 = vtanh.f32 %v147_v24 }
  0xda   :  { %v546_v26 = vpop.eup %545 }
  0xdb   :  { %v163_v27 = vmul.f32 %v546_v26, %v502_v25 }
  0xdc   :  { %v548_v28 = vpop.eup %547 }
  0xdd   :  { %v171_v29 = vsel %vm56_vm0, %v163_v27, 0.0  ;;  %v161_v30 = vmul.f32 %v548_v28, %v502_v25 }
  0xde   :  { %v550_v31 = vpop.eup %549  ;;  %172 = vadd.xlane.f32.xlu1 %v171_v29 }
  0xdf   :  { %v165_v32 = vsel %vm56_vm0, %v161_v30, 0.0  ;;  %v164_v33 = vmul.f32 %v550_v31, %v502_v25 }
  0xe0   :  { %v552_v34 = vpop.eup %551  ;;  %166 = vadd.xlane.f32.xlu0 %v165_v32 }
  0xe1   :  { %v174_v35 = vsel %vm56_vm0, %v164_v33, 0.0  ;;  %v162_v36 = vmul.f32 %v552_v34, %v502_v25 }
  0xe2   :  { %175 = vadd.xlane.f32.xlu1 %v174_v35 }
  0xe3   :  { %v168_v37 = vsel %vm56_vm0, %v162_v36, 0.0 }
  0xe4   :  { %169 = vadd.xlane.f32.xlu0 %v168_v37 }
 0x167   :  { %v173_v40 = vpop.xlane.xlu1 %172 }
 0x168   :  { %v181_v46 = vadd.f32 %v178_v41, %v173_v40 }
 0x169   :  { %v167_v42 = vpop.xlane.xlu0 %166 }
 0x16a   :  { %v179_v47 = vadd.f32 %v178_v41, %v167_v42  ;;  %v203_v52 = vrot.slane %v181_v46, %v693_v45 }
 0x16b   :  { %v176_v44 = vpop.xlane.xlu1 %175 }
 0x16c   :  { %v182_v48 = vadd.f32 %v178_v41, %v176_v44  ;;  %v192_v53 = vrot.slane %v179_v47, %v693_v45 }
 0x16d   :  { %v170_v49 = vpop.xlane.xlu0 %169 }
 0x16e   :  { %v207_v50 = vrot.slane %v182_v48, %v690_v43  ;;  %v180_v51 = vadd.f32 %v178_v41, %v170_v49 }
 0x170   :  { %v197_v54 = vrot.slane %v180_v51, %v690_v43  ;;  %v208_v56 = vsel %vm198_vm1, %v207_v50, %v203_v52 }
 0x172   :  { %v199_v55 = vsel %vm198_vm1, %v197_v54, %v192_v53 }
 0x173   :  { %v210_v57 = vsel %vm209_vm2, %v208_v56, %v199_v55 }
 0x174   :  { %v213_v58 = vsel %vm212_vm3, %v210_v57, -inf }
 0x175   :  { %214 = vmax.xlane.f32.xlu0 %v213_v58 }
 0x1fe   :  { %v215_v61 = vpop.xlane.xlu0 %214 }
 0x1ff   :  { %v220_v62 = vrot.slane %v215_v61, %v675_v13  ;;  %v224_v63 = vrot.slane %v215_v61, %v223_v60 }
 0x201   :  { %v227_v0 = vsub.f32 %v179_v47, %v220_v62  ;;  %v228_v1 = vsub.f32 %v180_v51, %v220_v62  ;;  %v229_v4 = vsub.f32 %v181_v46, %v224_v63  ;;  %v230_v7 = vsub.f32 %v182_v48, %v224_v63 }
 0x203   :  { %v231_v5 = vmul.f32 1.442695, %v227_v0  ;;  %v233_v6 = vmul.f32 1.442695, %v228_v1  ;;  %v235_v9 = vmul.f32 1.442695, %v229_v4 }
 0x204   :  { %v237_v10 = vmul.f32 1.442695, %v230_v7 }
 0x205   :  { %553 = vpow2.f32 %v231_v5 }
 0x206   :  { %555 = vpow2.f32 %v233_v6 }
 0x207   :  { %557 = vpow2.f32 %v235_v9 }
 0x208   :  { %559 = vpow2.f32 %v237_v10 }
 0x212   :  { %v554_v11 = vpop.eup %553 }
 0x213   :  { %v556_v12 = vpop.eup %555  ;;  %244 = vperm.xlu1 %539, %v554_v11  }
 0x214   :  { %247 = vperm.xlu0 %540, %v556_v12   ;;  %v558_v8 = vpop.eup %557 }
 0x215   :  { %v560_v14 = vpop.eup %559 }
 0x217   :  { %250 = vperm.xlu1 %539, %v558_v8  }
 0x21b   :  { %253 = vperm.xlu1 %539, %v560_v14  }
 0x28e   :  { %v245_v15 = vpop.permute.xlu1 %244 }
 0x28f   :  { %v248_v16 = vpop.permute.xlu0 %247  ;;  %v258_v19 = vrot.slane %v245_v15, %v693_v45 }
 0x290   :  { %v262_v18 = vrot.slane %v248_v16, %v690_v43 }
 0x292   :  { %v251_v17 = vpop.permute.xlu1 %250  ;;  %v263_v23 = vsel %vm198_vm1, %v262_v18, %v258_v19 }
 0x293   :  { %v267_v21 = vrot.slane %v251_v17, %v693_v45 }
 0x296   :  { %v254_v20 = vpop.permute.xlu1 %253 }
 0x297   :  { %v271_v22 = vrot.slane %v254_v20, %v690_v43 }
 0x299   :  { %v272_v24 = vsel %vm198_vm1, %v271_v22, %v267_v21 }
 0x29a   :  { %v273_v25 = vsel %vm209_vm2, %v272_v24, %v263_v23 }
 0x29b   :  { %v275_v26 = vsel %vm212_vm3, %v273_v25, 0.0 }
 0x29c   :  { %276 = vadd.xlane.f32.xlu1 %v275_v26 }
 0x325   :  { %v277_v27 = vpop.xlane.xlu1 %276 }
 0x326   :  { %561 = vrcp.f32 %v277_v27 }
 0x333   :  { %v562_v28 = vpop.eup %561 }
 0x334   :  { %v283_v29 = vrot.slane %v562_v28, %v675_v13  ;;  %v287_v32 = vrot.slane %v562_v28, %v223_v60 }
 0x336   :  { %v290_v30 = vmul.f32 %v554_v11, %v283_v29  ;;  %v291_v31 = vmul.f32 %v556_v12, %v283_v29  ;;  %v292_v35 = vmul.f32 %v558_v8, %v287_v32  ;;  %v293_v36 = vmul.f32 %v560_v14, %v287_v32 }
 0x338   :  { %299 = vperm.xlu1 %539, %v290_v30   ;;  %v331_v33 = vpack.c.bf16 %v291_v31, %v290_v30  ;;  %v332_v38 = vpack.c.bf16 %v293_v36, %v292_v35 }
 0x33a   :  { %v334_v34 = vunpack.c.l.b16 %v331_v33  ;;  %v335_v37 = vunpack.c.h.b16 %v331_v33  ;;  %v398_v13 = vunpack.c.l.b16 %v332_v38  ;;  %v399_v40 = vunpack.c.h.b16 %v332_v38 }
 0x33c   :  { %337 = vperm.xlu0 %540, %v334_v34  }
 0x340   :  { %340 = vperm.xlu0 %540, %v335_v37  }
 0x344   :  { %401 = vperm.xlu0 %540, %v398_v13  }
 0x348   :  { %404 = vperm.xlu0 %540, %v399_v40  }
 0x34c   :  { %302 = vperm.xlu0 %540, %v291_v31  }
 0x350   :  { %305 = vperm.xlu0 %540, %v292_v35  }
 0x354   :  { %308 = vperm.xlu0 %540, %v293_v36  }
 0x3b3   :  { %v300_v56 = vpop.permute.xlu1 %299 }
 0x3b4   :  { %v313_v59 = vrot.slane %v300_v56, %v693_v45 }
 0x3b7   :  { %v338_v41 = vpop.permute.xlu0 %337 }
 0x3b8   :  { %v345_v44 = vrot.slane %v338_v41, %v693_v45 }
 0x3bb   :  { %v341_v42 = vpop.permute.xlu0 %340 }
 0x3bc   :  { %v349_v46 = vrot.slane %v341_v42, %v690_v43 }
 0x3be   :  { %v350_v47 = vsel %vm198_vm1, %v349_v46, %v345_v44 }
 0x3bf   :  { %v351_v2 = vpack.c.b16 %v350_v47, %v350_v47  ;;  %v402_v48 = vpop.permute.xlu0 %401 }
 0x3c0   :  { %v409_v50 = vrot.slane %v402_v48, %v693_v45 }
 0x3c1   :  { %524 = vmatmul.mubr.msk.bf16.vlgmr.msra.gmra.mxu1 %vm353_vm5, %v351_v2 }
 0x3c2   :  { %528 = vmatpush3.bf16.msra.mxu1 %v664_v3  ;;  %529 = vmatprep.mubr.msk.bf16.mxu1 %vm610_vm4, %v609_v39 }
 0x3c3   :  { %v405_v49 = vpop.permute.xlu0 %404 }
 0x3c4   :  { %v413_v51 = vrot.slane %v405_v49, %v690_v43 }
 0x3c6   :  { %v414_v52 = vsel %vm198_vm1, %v413_v51, %v409_v50 }
 0x3c7   :  { %v415_v53 = vpack.c.b16 %v414_v52, %v414_v52  ;;  %v303_v54 = vpop.permute.xlu0 %302 }
 0x3c8   :  { %v317_v57 = vrot.slane %v303_v54, %v690_v43 }
 0x3c9   :  { %530 = vmatmul.mubr.msk.bf16.vlgmr.msra.gmra.mxu1 %vm353_vm5, %v415_v53 }
 0x3ca   :  { %v318_v61 = vsel %vm198_vm1, %v317_v57, %v313_v59 }
 0x3cb   :  { %v306_v55 = vpop.permute.xlu0 %305 }
 0x3cc   :  { %v322_v3 = vrot.slane %v306_v55, %v693_v45 }
 0x3cf   :  { %v309_v58 = vpop.permute.xlu0 %308 }
 0x3d0   :  { %v326_v60 = vrot.slane %v309_v58, %v690_v43 }
 0x3d2   :  { %v327_v62 = vsel %vm198_vm1, %v326_v60, %v322_v3 }
 0x3d3   :  { %v328_v63 = vsel %vm209_vm2, %v327_v62, %v318_v61 }
 0x3d4   :  { %330 = vst.msk [vmem:[#allocation5] sm:$0x3] %vm212_vm3, %v328_v63 }
 0x3d5   :  { %574 = shalt.err (!%p571_p4)
}
 0x3d6   :  { %486 = dma.vmem_to_hbm [thread:$0]  %s484_s7, 32, %s745_s6, [#allocation6]   ;;  %vm465_vm6 = vcmask 254976  }
 0x3d7   :  { %s612_s11 = smov [#allocation3]  }
 0x3d8   :  { %s473_s12 = sshll.u32 %s612_s11, 4  ;;  %s474_s12 = int_to_ptr.vmem [resolvable:$true] %s473_s12 }
 0x3d9   :  { %s583_s13 = scalar_lea.vmem %s474_s12, 32  ;;  %p588_p6 = scmp.lt.s32.totalorder %s474_s12, %s474_s12 }
 0x3da   :  { %p584_p5 = scmp.ne.s32.totalorder %s474_s12, %s583_s13  ;;  %p589_p7 = scmp.lt.s32.totalorder %s583_s13, %s583_s13 }
 0x3dc   :  { %p590_p8 = por %p589_p7, %p588_p6 }
 0x3de   :  { %p591_p9 = pnand %p590_p8, %p584_p5 }
 0x481   :  { %v391_v43 = vpop.f32.mrf.mxu1 }
 0x483   :  { %v525_v45 = vpop.f32.mrf.mxu1 }
 0x485   :  { %v394_v0 = vpop.f32.mrf.mxu1 }
 0x487   :  { %v526_v1 = vpop.f32.mrf.mxu1 }
 0x489   :  { %v454_v4 = vpop.f32.mrf.mxu1 }
 0x48a   :  { %v462_v5 = vrot.slane %v454_v4, 7 }
 0x48b   :  { %v531_v6 = vpop.f32.mrf.mxu1 }
 0x48c   :  { %v463_v7 = vsel %vm209_vm2, %v462_v5, %v391_v43 }
 0x48d   :  { %v457_v9 = vpop.f32.mrf.mxu1  ;;  %466 = vst.msk [vmem:[#allocation3] sm:$0x3] %vm465_vm6, %v463_v7 }
 0x48e   :  { %594 = shalt.err (!%p591_p9)
}
 0x48f   :  { %476 = dma.vmem_to_hbm [thread:$0]  %s474_s12, 32, %s744_s5, [#allocation4]   ;;  %v532_v10 = vpop.f32.mrf.mxu1 }
 0x490   :  { %603 = dma.done.wait [#allocation4], 32  }
 0x491   :  { %604 = vsyncadd [#allocation4], 4294967264 }
 0x492   :  { %605 = dma.done.wait [#allocation6], 32  }
 0x493   :  { %606 = vsyncadd [#allocation6], 4294967264 }
 0x494   :  { %493 = vsyncpa [#allocation4], 1 }
 0x495   :  { %494 = vsyncpa [#allocation6], 1 }

</bundles_post_ra>
